<compile_context>
chip_gen: v6e
topology: v6e:2x2x1
jax: 0.10.0
libtpu: 0.0.40
codegen_flags: <defaults>
</compile_context>

<pallas_src>
import jax
import jax.numpy as jnp
from jax.experimental import pallas as pl
from jax.experimental.pallas import tpu as pltpu


def _round_up(n, m):
    return ((n + m - 1) // m) * m


def _const_block_spec(shape):
    """BlockSpec for an operand fetched once and never re-indexed.
    Single-buffered (pl.Buffered(1)) to save VMEM (mainly v7x's 64 MiB);
    falls back to the default pipelining if pipeline_mode is unavailable."""
    index_map = lambda bi, ti: (0,) * len(shape)
    try:
        return pl.BlockSpec(shape, index_map, pipeline_mode=pl.Buffered(1))
    except (AttributeError, TypeError):
        return pl.BlockSpec(shape, index_map)


def _make_conv_glu_kernel(k, c_in, c_half, tt, n_w):
    """Fused Conv1d(stride=2, padding=k//2) + bias + GLU for one
    (batch, time-tile) block.

    x_ref holds the whole zero-padded, row-paired time axis of the current
    batch element: (T_half_pad, 2*c_in), where pair row r packs padded rows
    2r and 2r+1 along lanes.  Output row s+t (s = ti*tt) needs padded rows
    2(s+t) .. 2(s+t)+k-1, i.e. pair rows s+t .. s+t+ceil(k/2)-1, so tap pair m
    is one (tt, 2*c_in) x (2*c_in, c_out) MXU matmul on the window starting at
    pair row s+m, plus one (tt, c_in) x (c_in, c_out) matmul for an odd final
    tap (first c_in lanes of the last window).  Value/gate GLU halves share a
    single c_out-wide matmul and are split on the f32 accumulator.
    """
    n_pairs = k // 2
    has_tail = (k % 2 == 1)

    def kernel(x_ref, *refs):
        w_refs = refs[:n_w]
        b_ref = refs[n_w]
        o_ref = refs[n_w + 1]
        s = pl.multiple_of(pl.program_id(1) * tt, 8)   # tt is a multiple of 8

        acc = None
        for m in range(n_pairs):                       # taps (2m, 2m+1)
            xm = x_ref[pl.ds(s + m, tt), :]            # (tt, 2*c_in)
            cm = jnp.dot(xm, w_refs[m][...], preferred_element_type=jnp.float32)
            acc = cm if acc is None else acc + cm
        if has_tail:                                   # last odd tap k-1
            xm = x_ref[pl.ds(s + n_pairs, tt), pl.ds(0, c_in)]   # (tt, c_in)
            cm = jnp.dot(xm, w_refs[n_pairs][...], preferred_element_type=jnp.float32)
            acc = cm if acc is None else acc + cm

        acc = acc + b_ref[...]                         # f32 bias add
        val = acc[:, :c_half]                          # fused GLU: one matmul,
        gate = acc[:, c_half:]                         # slice accumulator
        o_ref[...] = (val * jax.nn.sigmoid(gate)).astype(o_ref.dtype)

    return kernel


def conv_glu_layer(x, lp, *, time_tile=512, vmem_limit_bytes=48 * 1024 * 1024):
    """One Conv1d(stride=2, padding=k//2) + GLU, channel-last.

    x : (B, T, C_in) activations; lp: prepared layer params.
    Returns (B, T_out, c_half).
    """
    B, T, c_in = x.shape
    k, c_out, c_half = lp["k"], lp["c_out"], lp["c_half"]
    assert c_in == lp["c_in"], (c_in, lp["c_in"])
    pad = k // 2
    t_out = (T + 2 * pad - k) // 2 + 1

    tt = min(_round_up(time_tile, 8), _round_up(t_out, 8))
    nt = -(-t_out // tt)
    tp_out = nt * tt                      # padded output rows (multiple of tt)
    t_half_pad = tp_out + k // 2          # pair rows the kernel may touch

    compute_dtype = lp["w_list"][0].dtype
    # Zero-pad (front: conv padding; back: pairing/tile/tail halo) and pair
    # consecutive rows.  The reshape is contiguous => free in XLA; only the pad
    # is one extra copy of the layer input (vs. ~2k x for a k-fold im2col).
    total_rows = 2 * t_half_pad
    back = total_rows - pad - T
    assert back >= 0, (total_rows, pad, T)
    x_p = jnp.pad(x.astype(compute_dtype), ((0, 0), (pad, back), (0, 0)))
    x_pair = x_p.reshape(B, t_half_pad, 2 * c_in)

    n_w = len(lp["w_list"])
    kernel = _make_conv_glu_kernel(k, c_in, c_half, tt, n_w)

    in_specs = [
        # Whole padded time axis per batch element; index constant along the
        # time-tile axis => DMA'd once per batch element, kept resident.
        # TODO(synk): for very long sequences (full-time block of many MiB)
        # switch to halo'd time blocks / a fused two-layer kernel so the
        # intermediate never round-trips HBM.
        pl.BlockSpec((pl.Squeezed(), t_half_pad, 2 * c_in), lambda bi, ti: (bi, 0, 0)),
    ]
    in_specs += [_const_block_spec(tuple(w.shape)) for w in lp["w_list"]]
    in_specs += [_const_block_spec((1, c_out))]

    itemsize = jnp.dtype(compute_dtype).itemsize
    cost = pl.CostEstimate(
        flops=2 * B * tp_out * (k * c_in) * c_out,
        transcendentals=B * tp_out * c_half,
        bytes_accessed=(B * t_half_pad * 2 * c_in * itemsize
                        + sum(int(w.size) * itemsize for w in lp["w_list"])
                        + 4 * c_out
                        + B * tp_out * c_half * itemsize),
    )

    out = pl.pallas_call(
        kernel,
        out_shape=jax.ShapeDtypeStruct((B, tp_out, c_half), compute_dtype),
        grid=(B, nt),
        in_specs=in_specs,
        out_specs=pl.BlockSpec((pl.Squeezed(), tt, c_half), lambda bi, ti: (bi, ti, 0)),
        compiler_params=pltpu.CompilerParams(
            dimension_semantics=("parallel", "parallel"),
            vmem_limit_bytes=vmem_limit_bytes,
        ),
        cost_estimate=cost,
    )(x_pair, *lp["w_list"], lp["bias"])
    return out[:, :t_out, :]


def init_conv1d_subsampler_params(key, in_channels, mid_channels, out_channels,
                                  kernel_sizes=(3, 3)):
    """Raw PyTorch-layout params; uniform(+/- 1/sqrt(fan_in)) like nn.Conv1d."""
    n_layers = len(kernel_sizes)
    params = []
    for i, k in enumerate(kernel_sizes):
        c_in = in_channels if i == 0 else mid_channels // 2
        c_out = mid_channels if i < n_layers - 1 else out_channels * 2
        key, kw, kb = jax.random.split(key, 3)
        bound = 1.0 / float(c_in * k) ** 0.5
        w = jax.random.uniform(kw, (c_out, c_in, k), jnp.float32, -bound, bound)
        b = jax.random.uniform(kb, (c_out,), jnp.float32, -bound, bound)
        params.append((w, b))
    return params


def prepare_conv1d_subsampler_params(raw_params, compute_dtype=jnp.bfloat16):
    """One-time param prep (hoisted out of forward).

    Taps are grouped by stride-2 pairs and stacked along the contraction dim so
    the kernel can consume the row-paired input directly:
      pair m   -> (2*c_in, c_out) block for taps (2m, 2m+1)
      odd tail -> (  c_in, c_out) block for tap k-1
    Value/gate halves stay fused in one c_out-wide weight.  Biases stay f32.
    """
    prepared = []
    for (w, b) in raw_params:
        c_out, c_in, k = w.shape
        taps = [jnp.transpose(w[:, :, j]) for j in range(k)]      # (c_in, c_out)
        w_list = []
        for m in range(k // 2):
            w_list.append(jnp.concatenate([taps[2 * m], taps[2 * m + 1]], axis=0))
        if k % 2 == 1:
            w_list.append(taps[k - 1])
        prepared.append(dict(
            k=k, c_in=c_in, c_out=c_out, c_half=c_out // 2,
            w_list=tuple(wi.astype(compute_dtype) for wi in w_list),
            bias=b.reshape(1, c_out).astype(jnp.float32),
        ))
    return prepared


def conv1d_subsampler_forward(src_tokens, src_lengths, prepared_params, *,
                              time_tile=512, out_dtype=jnp.float32):
    """src_tokens: (B, T, in_channels); src_lengths: (B,) int.

    Returns (x, out_lengths) with x: (T_out, B, out_channels), matching the
    PyTorch Conv1dSubsampler.forward.  Set out_dtype=None to keep the compute
    dtype (e.g. bf16) and skip the upcast pass if the downstream encoder
    accepts it (review suggestion).
    """
    x = src_tokens
    for lp in prepared_params:
        # TODO(synk): fuse both conv+GLU layers into one pallas_call so the
        # intermediate (B, T/2, mid/2) activation never round-trips HBM (needs
        # masking of padded tail rows feeding layer 2's receptive field).
        x = conv_glu_layer(x, lp, time_tile=time_tile)
    x = jnp.transpose(x, (1, 0, 2))                # (B,T,C) -> (T,B,C), one pass
    if out_dtype is not None:
        x = x.astype(out_dtype)
    out_lens = src_lengths
    for _ in prepared_params:
        out_lens = jnp.floor((out_lens.astype(jnp.float32) - 1.0) / 2.0 + 1.0)
        out_lens = out_lens.astype(src_lengths.dtype)
    return x, out_lens


def _reference_forward(src_tokens, src_lengths, raw_params, compute_dtype=jnp.float32):
    """Pure-JAX reference (lax conv).  compute_dtype mirrors the Pallas config:
    inputs/weights in compute_dtype, f32 accumulation, f32 bias/GLU, cast back."""
    x = jnp.transpose(src_tokens, (0, 2, 1)).astype(compute_dtype)   # (B, C, T)
    for (w, b) in raw_params:
        k = w.shape[-1]
        y = jax.lax.conv_general_dilated(
            x, w.astype(compute_dtype), window_strides=(2,),
            padding=[(k // 2, k // 2)], dimension_numbers=("NCH", "OIH", "NCH"),
            preferred_element_type=jnp.float32)
        y = y + b.astype(jnp.float32)[None, :, None]
        c = y.shape[1] // 2
        y = y[:, :c, :] * jax.nn.sigmoid(y[:, c:, :])
        x = y.astype(compute_dtype)
    x = jnp.transpose(x, (2, 0, 1)).astype(jnp.float32)              # (T_out, B, C)
    out_lens = src_lengths
    for _ in raw_params:
        out_lens = jnp.floor((out_lens.astype(jnp.float32) - 1.0) / 2.0 + 1.0)
        out_lens = out_lens.astype(src_lengths.dtype)
    return x, out_lens


def _run_case(key, B, T, in_ch, mid_ch, out_ch, kernel_sizes, time_tile, lengths):
    k_x, k_p = jax.random.split(key)
    src_tokens = jax.random.normal(k_x, (B, T, in_ch), jnp.float32)
    src_lengths = jnp.array(lengths, dtype=jnp.int32)
    raw = init_conv1d_subsampler_params(k_p, in_ch, mid_ch, out_ch, kernel_sizes)

    # --- exact-math config: f32 compute, strict check vs lax conv -------------
    p32 = prepare_conv1d_subsampler_params(raw, compute_dtype=jnp.float32)
    x32, l32 = conv1d_subsampler_forward(src_tokens, src_lengths, p32,
                                         time_tile=time_tile)
    jax.block_until_ready((x32, l32))
    r32, rl = _reference_forward(src_tokens, src_lengths, raw, jnp.float32)
    assert x32.shape == r32.shape, (x32.shape, r32.shape)
    assert x32.dtype == jnp.float32
    assert jnp.allclose(x32, r32, atol=1e-4, rtol=1e-4), "f32 mismatch vs reference"
    assert jnp.array_equal(l32, rl), "length mismatch"

    # --- performance config: bf16 inputs/weights, f32 accumulation ------------
    pbf = prepare_conv1d_subsampler_params(raw, compute_dtype=jnp.bfloat16)
    xbf, lbf = conv1d_subsampler_forward(src_tokens, src_lengths, pbf,
                                         time_tile=time_tile)
    jax.block_until_ready((xbf, lbf))
    rbf, _ = _reference_forward(src_tokens, src_lengths, raw, jnp.bfloat16)
    assert xbf.shape == r32.shape
    assert jnp.allclose(xbf, rbf, atol=2e-2, rtol=2e-2), "bf16 mismatch vs reference"
    assert jnp.array_equal(lbf, rl), "length mismatch (bf16)"
    return x32.shape


if __name__ == "__main__":
    key = jax.random.PRNGKey(0)
    k1, k2, k3 = jax.random.split(key, 3)

    # 1) toy config at small shapes (module defaults), single time tile.
    s1 = _run_case(k1, B=2, T=40, in_ch=16, mid_ch=32, out_ch=16,
                   kernel_sizes=(3, 3), time_tile=512, lengths=[40, 29])
    assert s1 == (10, 2, 16), s1

    # 2) lane-aligned channels (layer-2 c_in = 128) + multiple time tiles per
    #    batch element (exercises the resident-input / dynamic-window path).
    s2 = _run_case(k2, B=2, T=80, in_ch=80, mid_ch=256, out_ch=64,
                   kernel_sizes=(3, 3), time_tile=16, lengths=[80, 57])
    assert s2 == (20, 2, 64), s2

    # 3) odd kernel size 5 (two tap pairs + tail), odd sequence length, batch 1.
    s3 = _run_case(k3, B=1, T=21, in_ch=8, mid_ch=16, out_ch=8,
                   kernel_sizes=(5, 3), time_tile=512, lengths=[21])
    assert s3 == (6, 1, 8), s3

    print("KERNEL_OK")
</pallas_src>

<mosaic_0001>
module attributes {stable_mosaic.version = 11 : i64} {
  func.func @kernel(%arg0: i32, %arg1: i32, %arg2: memref<1x25x32xf32, #tpu.memory_space<vmem>>, %arg3: memref<32x32xf32, #tpu.memory_space<vmem>>, %arg4: memref<16x32xf32, #tpu.memory_space<vmem>>, %arg5: memref<1x32xf32, #tpu.memory_space<vmem>>, %arg6: memref<1x24x16xf32, #tpu.memory_space<vmem>>) attributes {dimension_semantics = [#tpu.dimension_semantics<parallel>, #tpu.dimension_semantics<parallel>], iteration_bounds = array<i64: 2, 1>, scalar_prefetch = 0 : i64, scratch_operands = 0 : i64, tpu.core_type = #tpu.core_type<tc>, window_params = [{transform_indices = @transform_0, window_bounds = array<i64: 1, 25, 32>}, {pipeline_mode = #tpu.pipeline_mode<synchronous>, transform_indices = @transform_1, window_bounds = array<i64: 32, 32>}, {pipeline_mode = #tpu.pipeline_mode<synchronous>, transform_indices = @transform_2, window_bounds = array<i64: 16, 32>}, {pipeline_mode = #tpu.pipeline_mode<synchronous>, transform_indices = @transform_3, window_bounds = array<i64: 1, 32>}, {transform_indices = @transform_4, window_bounds = array<i64: 1, 24, 16>}]} {
    %c24_i32 = arith.constant 24 : i32
    %0 = arith.muli %arg1, %c24_i32 : i32
    %1 = tpu.assume_multiple %0, 8 : i32
    %c0_i32 = arith.constant 0 : i32
    %2 = arith.addi %1, %c0_i32 : i32
    %c0 = arith.constant 0 : index
    %3 = arith.index_cast %2 : i32 to index
    %c0_0 = arith.constant 0 : index
    %4 = vector.load %arg2[%c0, %3, %c0_0] : memref<1x25x32xf32, #tpu.memory_space<vmem>>, vector<1x24x32xf32>
    %5 = vector.shape_cast %4 : vector<1x24x32xf32> to vector<24x32xf32>
    %c0_1 = arith.constant 0 : index
    %c0_2 = arith.constant 0 : index
    %6 = vector.load %arg3[%c0_1, %c0_2] : memref<32x32xf32, #tpu.memory_space<vmem>>, vector<32x32xf32>
    %cst = arith.constant dense<0.000000e+00> : vector<24x32xf32>
    %7 = tpu.matmul %5, %6, %cst {dimension_numbers = #tpu.dot_dimension_numbers<[1], [0], [0], [1], [0, 0, 1, 1], [], []>} : vector<24x32xf32>, vector<32x32xf32>, vector<24x32xf32> -> vector<24x32xf32>
    %c1_i32 = arith.constant 1 : i32
    %8 = arith.addi %1, %c1_i32 : i32
    %c0_3 = arith.constant 0 : index
    %9 = arith.index_cast %8 : i32 to index
    %c0_4 = arith.constant 0 : index
    %10 = vector.load %arg2[%c0_3, %9, %c0_4] : memref<1x25x32xf32, #tpu.memory_space<vmem>>, vector<1x24x16xf32>
    %11 = vector.shape_cast %10 : vector<1x24x16xf32> to vector<24x16xf32>
    %c0_5 = arith.constant 0 : index
    %c0_6 = arith.constant 0 : index
    %12 = vector.load %arg4[%c0_5, %c0_6] : memref<16x32xf32, #tpu.memory_space<vmem>>, vector<16x32xf32>
    %cst_7 = arith.constant dense<0.000000e+00> : vector<24x32xf32>
    %13 = tpu.matmul %11, %12, %cst_7 {dimension_numbers = #tpu.dot_dimension_numbers<[1], [0], [0], [1], [0, 0, 1, 1], [], []>} : vector<24x16xf32>, vector<16x32xf32>, vector<24x32xf32> -> vector<24x32xf32>
    %14 = arith.addf %7, %13 : vector<24x32xf32>
    %c0_8 = arith.constant 0 : index
    %c0_9 = arith.constant 0 : index
    %15 = vector.load %arg5[%c0_8, %c0_9] : memref<1x32xf32, #tpu.memory_space<vmem>>, vector<1x32xf32>
    %16 = vector.broadcast %15 : vector<1x32xf32> to vector<24x32xf32>
    %17 = arith.addf %14, %16 : vector<24x32xf32>
    %18 = vector.extract_strided_slice %17 {offsets = [0, 0], sizes = [24, 16], strides = [1, 1]} : vector<24x32xf32> to vector<24x16xf32>
    %19 = vector.extract_strided_slice %17 {offsets = [0, 16], sizes = [24, 16], strides = [1, 1]} : vector<24x32xf32> to vector<24x16xf32>
    %20 = arith.negf %19 : vector<24x16xf32>
    %21 = math.exp %20 : vector<24x16xf32>
    %cst_10 = arith.constant 1.000000e+00 : f32
    %22 = vector.broadcast %cst_10 : f32 to vector<24x16xf32>
    %23 = arith.addf %22, %21 : vector<24x16xf32>
    %24 = arith.divf %22, %23 : vector<24x16xf32>
    %25 = arith.mulf %18, %24 : vector<24x16xf32>
    %c0_11 = arith.constant 0 : index
    %c0_12 = arith.constant 0 : index
    %c0_13 = arith.constant 0 : index
    %26 = vector.load %arg6[%c0_11, %c0_12, %c0_13] : memref<1x24x16xf32, #tpu.memory_space<vmem>>, vector<1x24x16xf32>
    %27 = vector.shape_cast %26 : vector<1x24x16xf32> to vector<24x16xf32>
    %28 = vector.shape_cast %25 : vector<24x16xf32> to vector<1x24x16xf32>
    tpu.vector_store %arg6[%c0_11, %c0_12, %c0_13], %28 {strides = array<i32>} : memref<1x24x16xf32, #tpu.memory_space<vmem>>, vector<1x24x16xf32>,
    return
  }
  func.func @transform_0(%arg0: i32, %arg1: i32) -> (i32, i32, i32) {
    %c0_i32 = arith.constant 0 : i32
    %c0_i32_0 = arith.constant 0 : i32
    %c0_i32_1 = arith.constant 0 : i32
    return %arg0, %c0_i32, %c0_i32_0 : i32, i32, i32
  }
  func.func @transform_1(%arg0: i32, %arg1: i32) -> (i32, i32) {
    %c0_i32 = arith.constant 0 : i32
    %c0_i32_0 = arith.constant 0 : i32
    %c0_i32_1 = arith.constant 0 : i32
    return %c0_i32, %c0_i32_0 : i32, i32
  }
  func.func @transform_2(%arg0: i32, %arg1: i32) -> (i32, i32) {
    %c0_i32 = arith.constant 0 : i32
    %c0_i32_0 = arith.constant 0 : i32
    %c0_i32_1 = arith.constant 0 : i32
    return %c0_i32, %c0_i32_0 : i32, i32
  }
  func.func @transform_3(%arg0: i32, %arg1: i32) -> (i32, i32) {
    %c0_i32 = arith.constant 0 : i32
    %c0_i32_0 = arith.constant 0 : i32
    %c0_i32_1 = arith.constant 0 : i32
    return %c0_i32, %c0_i32_0 : i32, i32
  }
  func.func @transform_4(%arg0: i32, %arg1: i32) -> (i32, i32, i32) {
    %c0_i32 = arith.constant 0 : i32
    %c0_i32_0 = arith.constant 0 : i32
    return %arg0, %arg1, %c0_i32 : i32, i32, i32
  }
}

</mosaic_0001>

<bundles_post_ra>
// kernel: tpu_custom_call.1
= control target key start
LH: loop header
LB: loop body
LE: loop exit
PB: predicated region body
PF: predicated region fallthrough
CT: control target
= control target key end

     0   :  { %s707_s15 = smov 0   ;;  %s709_s16 = smov 0   ;;  %s780_s0 = inlined_call_operand.vmem [shape: f32[2,25,32], index: 0, kind: input, shape index: {}]   ;;  %s781_s1 = inlined_call_operand.vmem [shape: f32[32,32], index: 1, kind: input, shape index: {}]   ;;  %s782_s2 = inlined_call_operand.vmem [shape: f32[16,32], index: 2, kind: input, shape index: {}]   ;;  %s783_s3 = inlined_call_operand.vmem [shape: f32[1,32], index: 3, kind: input, shape index: {}]   ;;  %s784_s4 = inlined_call_operand.vmem [shape: f32[2,24,16], index: 4, kind: output, shape index: {}]  }
   0x1   :  { %s711_s17 = smov 0  }
   0x2 LB: > { %s26_s18 = sadd.s32 1, %s673_s16  ;;  %p553_p0 = scmp.ge.s32.totalorder %s677_s17, 1  ;;  %s677_s17 = sphi %s711_s17, %s14_s17   ;;  %s673_s16 = sphi %s709_s16, %s786_s16   ;;  %s669_s15 = sphi %s707_s15, %s785_s15  }
   0x3   : > { %p28_p1 = scmp.ge.s32.totalorder %s26_s18, 2  ;;  %p176_p2 = scmp.lt.s32.totalorder %s677_s17, 3 }
   0x5   : > { %s788_s18 = smov (%p28_p1, %s26_s18), 0  ;;  %p177_p3 = pnand %p553_p0, %p176_p2 }
   0x6   : > { %p206_p4 = scmp.lt.s32.totalorder (!%p177_p3), %s669_s15, 1  ;;  %s681_s11 = smov (!%p177_p3), 112  }
   0x7   : > { %180 = sbr.rel (%p177_p3) target bundleno = 376 (0x178), region = 36 }
   0xc   : > { %v229_v0 = vld [vmem:[%s781_s1 + $0x18] sm:$0xff]  ;;  %v236_v1 = vld [vmem:[%s782_s2 + $0x8] sm:$0xff]  ;;  %v679_v2 = vmov 0.0   ;;  %v228_v3 = vld [vmem:[%s781_s1 + $0x10] sm:$0xff]  ;;  %s790_s15 = smov (!%p206_p4, %s669_s15), 1  ;;  %vm237_vm0 = vcmask 130048  }
   0xd   : > { %598 = vmatprep.subr.mxu1 %v679_v2  ;;  %585 = vmatprep.subr.mxu0 %v679_v2  ;;  %v235_v4 = vld [vmem:[%s782_s2] sm:$0xff]  ;;  %v227_v5 = vld [vmem:[%s781_s1 + $0x8] sm:$0xff]  ;;  %s572_s29 = sshll.u32 %s790_s15, 5  ;;  %vm680_vm1 = vmmov 0   ;;  %vm327_vm2 = vcmask 261120   ;;  %s615_s12 = smul.u32 24, %s790_s15 }
   0xe   : > { %599 = vmatpush3.msra.mxu1 %v229_v0  ;;  %586 = vmatpush3.msra.mxu0 %v236_v1  ;;  %s210_s6 = scalar_lea.vmem %s780_s0, %s572_s29  ;;  %v226_v6 = vld [vmem:[%s781_s1] sm:$0xff] }
   0xf   : > { %600 = vmatprep.subr.mxu1 %v679_v2  ;;  %587 = vmatprep.subr.mxu0 %v679_v2  ;;  %v557_v7 = vld [vmem:[%s210_s6 + $0x1] sm:$0xff]  ;;  %v558_v9 = vld [vmem:[%s210_s6 + $0x9] sm:$0xff]  ;;  %v559_v11 = vld [vmem:[%s210_s6 + $0x11] sm:$0xff]  ;;  %s219_s19 = scalar_lea.vmem %s784_s4, %s615_s12 }
  0x10   : > { %601 = vmatpush3.msra.mxu1 %v228_v3  ;;  %588 = vmatpush3.msra.mxu0 %v235_v4  ;;  %v223_v8 = vld [vmem:[%s210_s6] sm:$0xff]  ;;  %v224_v10 = vld [vmem:[%s210_s6 + $0x8] sm:$0xff]  ;;  %v225_v12 = vld [vmem:[%s210_s6 + $0x10] sm:$0xff] }
  0x11   : > { %602 = vmatprep.subr.mxu1 %v679_v2  ;;  %589 = vmatprep.mubr.msk.f32.mxu0 %vm680_vm1, %v679_v2  ;;  %v566_v16 = vld [vmem:[%s783_s3] ss:$0 sm:$0xff] }
  0x12   : > { %603 = vmatpush3.msra.mxu1 %v227_v5  ;;  %606 = vmatprep.mubr.msk.f32.mxu1 %vm680_vm1, %v679_v2 }
  0x13   : > { %590 = vmatmul.mubr.msk.f32.vlgmr.msra.gmra.mxu0 %vm237_vm0, %v557_v7  ;;  %604 = vmatprep.subr.mxu1 %v679_v2 }
  0x14   : > { %605 = vmatpush3.msra.mxu1 %v226_v6  ;;  %592 = vmatprep.mubr.msk.f32.mxu0 %vm680_vm1, %v679_v2 }
  0x15   : > { %607 = vmatmul.mubr.msk.f32.vlgmr.msra.gmra.mxu1 %vm327_vm2, %v223_v8 }
  0x16   : > { %609 = vmatprep.mubr.msk.f32.mxu1 %vm680_vm1, %v679_v2 }
  0x17   : > { %593 = vmatmul.mubr.msk.f32.gmra.mxu0 %vm237_vm0, %v558_v9 }
  0x18   : > { %595 = vmatprep.mubr.msk.f32.mxu0 %vm680_vm1, %v679_v2 }
  0x19   : > { %610 = vmatmul.mubr.msk.f32.gmra.mxu1 %vm327_vm2, %v224_v10 }
  0x1a   : > { %612 = vmatprep.mubr.msk.f32.mxu1 %vm680_vm1, %v679_v2 }
  0x1b   : > { %596 = vmatmul.mubr.msk.f32.gmra.mxu0 %vm237_vm0, %v559_v11 }
  0x1d   : > { %613 = vmatmul.mubr.msk.f32.gmra.mxu1 %vm327_vm2, %v225_v12 }
  0xd3   : > { %v313_v13 = vpop.f32.mrf.mxu0 }
  0xd5   : > { %v591_v14 = vpop.f32.mrf.mxu0  ;;  %v403_v15 = vpop.f32.mrf.mxu1 }
  0xd6   : > { %v404_v17 = vadd.f32 %v403_v15, %v313_v13 }
  0xd7   : > { %v318_v18 = vpop.f32.mrf.mxu0  ;;  %v608_v19 = vpop.f32.mrf.mxu1 }
  0xd8   : > { %v424_v20 = vadd.f32 %v566_v16, %v404_v17 }
  0xd9   : > { %v594_v21 = vpop.f32.mrf.mxu0  ;;  %v408_v22 = vpop.f32.mrf.mxu1 }
  0xda   : > { %v567_v23 = vmul.f32 -1.442695, %v424_v20  ;;  %v409_v24 = vadd.f32 %v408_v22, %v318_v18 }
  0xdb   : > { %v323_v25 = vpop.f32.mrf.mxu0  ;;  %v611_v26 = vpop.f32.mrf.mxu1 }
  0xdc   : > { %643 = vpow2.f32 %v567_v23  ;;  %v425_v27 = vadd.f32 %v566_v16, %v409_v24 }
  0xdd   : > { %v597_v28 = vpop.f32.mrf.mxu0  ;;  %v413_v29 = vpop.f32.mrf.mxu1 }
  0xde   : > { %v568_v30 = vmul.f32 -1.442695, %v425_v27  ;;  %v414_v31 = vadd.f32 %v413_v29, %v323_v25 }
  0xdf   : > { %v614_v32 = vpop.f32.mrf.mxu1 }
  0xe0   : > { %645 = vpow2.f32 %v568_v30  ;;  %v426_v33 = vadd.f32 %v566_v16, %v414_v31 }
  0xe2   : > { %v569_v34 = vmul.f32 -1.442695, %v426_v33 }
  0xe4   : > { %647 = vpow2.f32 %v569_v34 }
  0xe9   : > { %v644_v35 = vpop.eup %643 }
  0xea   : > { %v436_v36 = vadd.f32 1.0, %v644_v35 }
  0xec   : > { %649 = vrcp.f32 %v436_v36 }
  0xed   : > { %v646_v37 = vpop.eup %645 }
  0xee   : > { %v437_v38 = vadd.f32 1.0, %v646_v37 }
  0xf0   : > { %651 = vrcp.f32 %v437_v38 }
  0xf1   : > { %v648_v39 = vpop.eup %647 }
  0xf2   : > { %v438_v40 = vadd.f32 1.0, %v648_v39 }
  0xf4   : > { %653 = vrcp.f32 %v438_v40 }
  0xf9   : > { %v650_v41 = vpop.eup %649 }
  0xfa   : > { %448 = vrot.lane.b32.xlu0 %v650_v41, %s681_s11 }
  0xfd   : > { %v652_v42 = vpop.eup %651 }
  0xfe   : > { %450 = vrot.lane.b32.xlu0 %v652_v42, %s681_s11 }
 0x101   : > { %v654_v43 = vpop.eup %653 }
 0x102   : > { %452 = vrot.lane.b32.xlu1 %v654_v43, %s681_s11 }
 0x16c   : > { %v449_v44 = vpop.permute.xlu0 %448 }
 0x16d   : > { %v457_v45 = vmul.f32 %v449_v44, %v424_v20 }
 0x16f   : > { %460 = vst.msk [vmem:[%s219_s19] sm:$0xff] %vm237_vm0, %v457_v45 }
 0x170   : > { %v451_v46 = vpop.permute.xlu0 %450 }
 0x171   : > { %v458_v47 = vmul.f32 %v451_v46, %v425_v27 }
 0x173   : > { %461 = vst.msk [vmem:[%s219_s19 + $0x8] sm:$0xff] %vm237_vm0, %v458_v47 }
 0x174   : > { %v453_v48 = vpop.permute.xlu1 %452 }
 0x175   : > { %v459_v49 = vmul.f32 %v453_v48, %v426_v33 }
 0x177   : > { %462 = vst.msk [vmem:[%s219_s19 + $0x10] sm:$0xff] %vm237_vm0, %v459_v49 }
 0x178 PF: > { %s14_s17 = sadd.s32 1, %s677_s17   ;;  %s785_s15 = smov %s673_s16 }
 0x179   : > { %p11_p5 = scmp.ge.s32.totalorder %s14_s17, 4   ;;  %s786_s16 = smov %s788_s18 }
 0x17b   :  { %13 = sbr.rel (!%p11_p5) target bundleno = 2 (0x2), region = 68 }

</bundles_post_ra>
